<compile_context>
chip_gen: v7x
topology: tpu7x:2x2x1
jax: 0.10.0
libtpu: 0.0.40
codegen_flags: <defaults>
</compile_context>

<pallas_src>
import functools

import jax
import jax.numpy as jnp
from jax.experimental import pallas as pl
from jax.experimental.pallas import tpu as pltpu


def _dice_bce_kernel(x_ref, t_ref, o_ref, *, sub_rows):
    i = pl.program_id(1)  # inner (reduction / "arbitrary") axis

    @pl.when(i == 0)
    def _():
        o_ref[...] = jnp.zeros_like(o_ref)

    x = x_ref[...].astype(jnp.float32)
    t = t_ref[...].astype(jnp.float32)

    # Fused sigmoid + softplus sharing a single exp per element.
    e = jnp.exp(-jnp.abs(x))
    inv = 1.0 / (1.0 + e)
    p = jnp.where(x >= 0, inv, e * inv)                  # sigmoid(x)
    bce = jnp.log1p(e) + jnp.maximum(x, 0.0) - t * x     # softplus(x) - t*x

    # Pure-VPU partial reduce: (block_rows, 128) -> (8, 128); no XLU in the loop.
    def fold(v):
        return v.reshape(sub_rows, 8, 128).sum(axis=0)

    o_ref[0, 0] += fold(p)
    o_ref[0, 1] += fold(t)
    o_ref[0, 2] += fold(p * t)
    o_ref[0, 3] += fold(bce)


def dice_bce_loss(inputs, targets, smooth=1.0, *,
                  max_block_rows=2048, num_cores=2, lanes=128):
    """Pallas implementation of DiceBCELoss.forward (returns scalar f32)."""
    n_valid = inputs.size
    x = inputs.reshape(-1)          # no dtype cast here: stream native dtype
    t = targets.reshape(-1)

    rows_needed = (n_valid + lanes - 1) // lanes
    block_rows = min(max_block_rows, max(8, ((rows_needed + 7) // 8) * 8))
    total_blocks = (rows_needed + block_rows - 1) // block_rows
    steps_per_core = (total_blocks + num_cores - 1) // num_cores
    total_rows = num_cores * steps_per_core * block_rows

    n_pad = total_rows * lanes - n_valid
    if n_pad:
        # Pad logits with a large-but-finite negative (sigmoid/softplus ~ 0)
        # and targets with 0 (t*x == 0), so the tail contributes nothing and
        # no per-step mask is needed.  When the size already matches the tile
        # this copy is skipped entirely.
        x = jnp.pad(x, (0, n_pad), constant_values=-30.0)
        t = jnp.pad(t, (0, n_pad), constant_values=0.0)
    x = x.reshape(total_rows, lanes)
    t = t.reshape(total_rows, lanes)

    kernel = functools.partial(_dice_bce_kernel, sub_rows=block_rows // 8)

    partials = pl.pallas_call(
        kernel,
        out_shape=jax.ShapeDtypeStruct((num_cores, 4, 8, lanes), jnp.float32),
        grid_spec=pltpu.PrefetchScalarGridSpec(
            num_scalar_prefetch=0,
            grid=(num_cores, steps_per_core),
            in_specs=[
                pl.BlockSpec((block_rows, lanes),
                             lambda c, i: (c * steps_per_core + i, 0)),
                pl.BlockSpec((block_rows, lanes),
                             lambda c, i: (c * steps_per_core + i, 0)),
            ],
            out_specs=pl.BlockSpec((1, 4, 8, lanes),
                                   lambda c, i: (c, 0, 0, 0)),
        ),
        compiler_params=pltpu.CompilerParams(
            dimension_semantics=("parallel", "arbitrary"),
        ),
    )(x, t)

    # Tiny (num_cores*4*8*128 element) final reduction + scalar epilogue in JAX.
    sums = jnp.sum(partials, axis=(0, 2, 3))   # [sum_p, sum_t, sum_pt, sum_bce]
    sum_p, sum_t, intersection, sum_bce = sums[0], sums[1], sums[2], sums[3]
    dice_coeff = 1.0 - (2.0 * intersection + smooth) / (sum_p + sum_t + smooth)
    bce = sum_bce / n_valid
    return bce + dice_coeff


def _reference(inputs, targets, smooth=1.0):
    p = jax.nn.sigmoid(inputs.astype(jnp.float32)).reshape(-1)
    t = targets.astype(jnp.float32).reshape(-1)
    intersection = jnp.sum(p * t)
    dice_coeff = 1.0 - (2.0 * intersection + smooth) / (jnp.sum(p) + jnp.sum(t) + smooth)
    logp = jnp.maximum(jnp.log(p), -100.0)         # PyTorch-style clamp
    log1mp = jnp.maximum(jnp.log1p(-p), -100.0)
    bce = jnp.mean(-(t * logp + (1.0 - t) * log1mp))
    return bce + dice_coeff


if __name__ == "__main__":
    key = jax.random.PRNGKey(0)
    k1, k2 = jax.random.split(key)
    # Small NCHW-like shapes: batch=2, channels=4, spatial=16x16.
    inputs = jax.random.normal(k1, (2, 4, 16, 16), dtype=jnp.float32)
    targets = (jax.random.uniform(k2, (2, 4, 16, 16)) > 0.5).astype(jnp.float32)

    loss = dice_bce_loss(inputs, targets, smooth=1.0)
    jax.block_until_ready(loss)

    ref = _reference(inputs, targets, smooth=1.0)
    assert jnp.allclose(loss, ref, atol=1e-4, rtol=1e-4), (loss, ref)
    print("KERNEL_OK")
</pallas_src>

<mosaic_0001>
module attributes {stable_mosaic.version = 11 : i64} {
  func.func @_dice_bce_kernel(%arg0: i32, %arg1: i32, %arg2: memref<16x128xf32, #tpu.memory_space<vmem>>, %arg3: memref<16x128xf32, #tpu.memory_space<vmem>>, %arg4: memref<1x4x8x128xf32, #tpu.memory_space<vmem>>) attributes {dimension_semantics = [#tpu.dimension_semantics<parallel>, #tpu.dimension_semantics<arbitrary>], iteration_bounds = array<i64: 2, 1>, scalar_prefetch = 0 : i64, scratch_operands = 0 : i64, tpu.core_type = #tpu.core_type<tc>, window_params = [{transform_indices = @transform_0, window_bounds = array<i64: 16, 128>}, {transform_indices = @transform_1, window_bounds = array<i64: 16, 128>}, {transform_indices = @transform_2, window_bounds = array<i64: 1, 4, 8, 128>}]} {
    %c0_i32 = arith.constant 0 : i32
    %0 = arith.cmpi eq, %arg1, %c0_i32 : i32
    %1 = arith.extui %0 : i1 to i32
    %c0_i32_0 = arith.constant 0 : i32
    %2 = arith.cmpi ne, %1, %c0_i32_0 : i32
    scf.if %2 {
      %cst_41 = arith.constant 0.000000e+00 : f32
      %56 = vector.broadcast %cst_41 : f32 to vector<1x4x8x128xf32>
      %c0_42 = arith.constant 0 : index
      %c0_43 = arith.constant 0 : index
      %c0_44 = arith.constant 0 : index
      %c0_45 = arith.constant 0 : index
      %57 = vector.load %arg4[%c0_42, %c0_43, %c0_44, %c0_45] : memref<1x4x8x128xf32, #tpu.memory_space<vmem>>, vector<1x4x8x128xf32>
      tpu.vector_store %arg4[%c0_42, %c0_43, %c0_44, %c0_45], %56 {strides = array<i32>} : memref<1x4x8x128xf32, #tpu.memory_space<vmem>>, vector<1x4x8x128xf32>,
    } else {
    }
    %c0 = arith.constant 0 : index
    %c0_1 = arith.constant 0 : index
    %3 = vector.load %arg2[%c0, %c0_1] : memref<16x128xf32, #tpu.memory_space<vmem>>, vector<16x128xf32>
    %c0_2 = arith.constant 0 : index
    %c0_3 = arith.constant 0 : index
    %4 = vector.load %arg3[%c0_2, %c0_3] : memref<16x128xf32, #tpu.memory_space<vmem>>, vector<16x128xf32>
    %5 = math.absf %3 : vector<16x128xf32>
    %cst = arith.constant 0.000000e+00 : f32
    %6 = vector.broadcast %cst : f32 to vector<16x128xf32>
    %7 = arith.subf %6, %5 : vector<16x128xf32>
    %8 = math.exp %7 : vector<16x128xf32>
    %cst_4 = arith.constant 1.000000e+00 : f32
    %9 = vector.broadcast %cst_4 : f32 to vector<16x128xf32>
    %10 = arith.addf %9, %8 : vector<16x128xf32>
    %cst_5 = arith.constant 1.000000e+00 : f32
    %11 = vector.broadcast %cst_5 : f32 to vector<16x128xf32>
    %12 = arith.divf %11, %10 : vector<16x128xf32>
    %cst_6 = arith.constant 0.000000e+00 : f32
    %13 = vector.broadcast %cst_6 : f32 to vector<16x128xf32>
    %14 = arith.cmpf oge, %3, %13 : vector<16x128xf32>
    %15 = arith.mulf %8, %12 : vector<16x128xf32>
    %16 = arith.select %14, %12, %15 : vector<16x128xi1>, vector<16x128xf32>
    %17 = math.log1p %8 : vector<16x128xf32>
    %cst_7 = arith.constant 0.000000e+00 : f32
    %18 = vector.broadcast %cst_7 : f32 to vector<16x128xf32>
    %19 = arith.maximumf %3, %18 : vector<16x128xf32>
    %20 = arith.addf %17, %19 : vector<16x128xf32>
    %21 = arith.mulf %4, %3 : vector<16x128xf32>
    %22 = arith.subf %20, %21 : vector<16x128xf32>
    %c0_8 = arith.constant 0 : index
    %c0_9 = arith.constant 0 : index
    %c0_10 = arith.constant 0 : index
    %c0_11 = arith.constant 0 : index
    %23 = vector.load %arg4[%c0_8, %c0_9, %c0_10, %c0_11] : memref<1x4x8x128xf32, #tpu.memory_space<vmem>>, vector<1x1x8x128xf32>
    %24 = vector.shape_cast %23 : vector<1x1x8x128xf32> to vector<8x128xf32>
    %25 = vector.shape_cast %16 : vector<16x128xf32> to vector<2x8x128xf32>
    %cst_12 = arith.constant dense<0.000000e+00> : vector<8x128xf32>
    %26 = vector.multi_reduction <add>, %25, %cst_12 [0] : vector<2x8x128xf32> to vector<8x128xf32>
    %27 = arith.addf %24, %26 : vector<8x128xf32>
    %c0_13 = arith.constant 0 : index
    %c0_14 = arith.constant 0 : index
    %c0_15 = arith.constant 0 : index
    %c0_16 = arith.constant 0 : index
    %28 = vector.load %arg4[%c0_13, %c0_14, %c0_15, %c0_16] : memref<1x4x8x128xf32, #tpu.memory_space<vmem>>, vector<1x1x8x128xf32>
    %29 = vector.shape_cast %28 : vector<1x1x8x128xf32> to vector<8x128xf32>
    %30 = vector.shape_cast %27 : vector<8x128xf32> to vector<1x1x8x128xf32>
    tpu.vector_store %arg4[%c0_13, %c0_14, %c0_15, %c0_16], %30 {strides = array<i32>} : memref<1x4x8x128xf32, #tpu.memory_space<vmem>>, vector<1x1x8x128xf32>,
    %c0_17 = arith.constant 0 : index
    %c1 = arith.constant 1 : index
    %c0_18 = arith.constant 0 : index
    %c0_19 = arith.constant 0 : index
    %31 = vector.load %arg4[%c0_17, %c1, %c0_18, %c0_19] : memref<1x4x8x128xf32, #tpu.memory_space<vmem>>, vector<1x1x8x128xf32>
    %32 = vector.shape_cast %31 : vector<1x1x8x128xf32> to vector<8x128xf32>
    %33 = vector.shape_cast %4 : vector<16x128xf32> to vector<2x8x128xf32>
    %cst_20 = arith.constant dense<0.000000e+00> : vector<8x128xf32>
    %34 = vector.multi_reduction <add>, %33, %cst_20 [0] : vector<2x8x128xf32> to vector<8x128xf32>
    %35 = arith.addf %32, %34 : vector<8x128xf32>
    %c0_21 = arith.constant 0 : index
    %c1_22 = arith.constant 1 : index
    %c0_23 = arith.constant 0 : index
    %c0_24 = arith.constant 0 : index
    %36 = vector.load %arg4[%c0_21, %c1_22, %c0_23, %c0_24] : memref<1x4x8x128xf32, #tpu.memory_space<vmem>>, vector<1x1x8x128xf32>
    %37 = vector.shape_cast %36 : vector<1x1x8x128xf32> to vector<8x128xf32>
    %38 = vector.shape_cast %35 : vector<8x128xf32> to vector<1x1x8x128xf32>
    tpu.vector_store %arg4[%c0_21, %c1_22, %c0_23, %c0_24], %38 {strides = array<i32>} : memref<1x4x8x128xf32, #tpu.memory_space<vmem>>, vector<1x1x8x128xf32>,
    %c0_25 = arith.constant 0 : index
    %c2 = arith.constant 2 : index
    %c0_26 = arith.constant 0 : index
    %c0_27 = arith.constant 0 : index
    %39 = vector.load %arg4[%c0_25, %c2, %c0_26, %c0_27] : memref<1x4x8x128xf32, #tpu.memory_space<vmem>>, vector<1x1x8x128xf32>
    %40 = vector.shape_cast %39 : vector<1x1x8x128xf32> to vector<8x128xf32>
    %41 = arith.mulf %16, %4 : vector<16x128xf32>
    %42 = vector.shape_cast %41 : vector<16x128xf32> to vector<2x8x128xf32>
    %cst_28 = arith.constant dense<0.000000e+00> : vector<8x128xf32>
    %43 = vector.multi_reduction <add>, %42, %cst_28 [0] : vector<2x8x128xf32> to vector<8x128xf32>
    %44 = arith.addf %40, %43 : vector<8x128xf32>
    %c0_29 = arith.constant 0 : index
    %c2_30 = arith.constant 2 : index
    %c0_31 = arith.constant 0 : index
    %c0_32 = arith.constant 0 : index
    %45 = vector.load %arg4[%c0_29, %c2_30, %c0_31, %c0_32] : memref<1x4x8x128xf32, #tpu.memory_space<vmem>>, vector<1x1x8x128xf32>
    %46 = vector.shape_cast %45 : vector<1x1x8x128xf32> to vector<8x128xf32>
    %47 = vector.shape_cast %44 : vector<8x128xf32> to vector<1x1x8x128xf32>
    tpu.vector_store %arg4[%c0_29, %c2_30, %c0_31, %c0_32], %47 {strides = array<i32>} : memref<1x4x8x128xf32, #tpu.memory_space<vmem>>, vector<1x1x8x128xf32>,
    %c0_33 = arith.constant 0 : index
    %c3 = arith.constant 3 : index
    %c0_34 = arith.constant 0 : index
    %c0_35 = arith.constant 0 : index
    %48 = vector.load %arg4[%c0_33, %c3, %c0_34, %c0_35] : memref<1x4x8x128xf32, #tpu.memory_space<vmem>>, vector<1x1x8x128xf32>
    %49 = vector.shape_cast %48 : vector<1x1x8x128xf32> to vector<8x128xf32>
    %50 = vector.shape_cast %22 : vector<16x128xf32> to vector<2x8x128xf32>
    %cst_36 = arith.constant dense<0.000000e+00> : vector<8x128xf32>
    %51 = vector.multi_reduction <add>, %50, %cst_36 [0] : vector<2x8x128xf32> to vector<8x128xf32>
    %52 = arith.addf %49, %51 : vector<8x128xf32>
    %c0_37 = arith.constant 0 : index
    %c3_38 = arith.constant 3 : index
    %c0_39 = arith.constant 0 : index
    %c0_40 = arith.constant 0 : index
    %53 = vector.load %arg4[%c0_37, %c3_38, %c0_39, %c0_40] : memref<1x4x8x128xf32, #tpu.memory_space<vmem>>, vector<1x1x8x128xf32>
    %54 = vector.shape_cast %53 : vector<1x1x8x128xf32> to vector<8x128xf32>
    %55 = vector.shape_cast %52 : vector<8x128xf32> to vector<1x1x8x128xf32>
    tpu.vector_store %arg4[%c0_37, %c3_38, %c0_39, %c0_40], %55 {strides = array<i32>} : memref<1x4x8x128xf32, #tpu.memory_space<vmem>>, vector<1x1x8x128xf32>,
    return
  }
  func.func @transform_0(%arg0: i32, %arg1: i32) -> (i32, i32) {
    %c1_i32 = arith.constant 1 : i32
    %0 = arith.muli %arg0, %c1_i32 : i32
    %1 = arith.addi %0, %arg1 : i32
    %c0_i32 = arith.constant 0 : i32
    %c0_i32_0 = arith.constant 0 : i32
    return %1, %c0_i32 : i32, i32
  }
  func.func @transform_1(%arg0: i32, %arg1: i32) -> (i32, i32) {
    %c1_i32 = arith.constant 1 : i32
    %0 = arith.muli %arg0, %c1_i32 : i32
    %1 = arith.addi %0, %arg1 : i32
    %c0_i32 = arith.constant 0 : i32
    %c0_i32_0 = arith.constant 0 : i32
    return %1, %c0_i32 : i32, i32
  }
  func.func @transform_2(%arg0: i32, %arg1: i32) -> (i32, i32, i32, i32) {
    %c0_i32 = arith.constant 0 : i32
    %c0_i32_0 = arith.constant 0 : i32
    %c0_i32_1 = arith.constant 0 : i32
    %c0_i32_2 = arith.constant 0 : i32
    return %arg0, %c0_i32, %c0_i32_0, %c0_i32_1 : i32, i32, i32, i32
  }
}

</mosaic_0001>

<bundles_post_ra>
// kernel: tpu_custom_call.1
= control target key start
LH: loop header
LB: loop body
LE: loop exit
PB: predicated region body
PF: predicated region fallthrough
CT: control target
= control target key end

     0   :  { %7 = vsyncpa [#allocation3], 0  ;;  %s955_s0 = inlined_call_operand.hbm [shape: f32[32,128], index: 0, kind: input, shape index: {}]   ;;  %s956_s1 = inlined_call_operand.hbm [shape: f32[32,128], index: 1, kind: input, shape index: {}]   ;;  %s957_s2 = inlined_call_operand.hbm [shape: f32[2,4,8,128], index: 2, kind: output, shape index: {}]  }
   0x1   :  { %9 = vsyncpa [#allocation3 + $0x1], 0 }
   0x2   :  { %10 = vsyncpa [#allocation6], 0 }
   0x3   :  { %12 = vsyncpa [#allocation6 + $0x1], 0 }
   0x4   :  { %13 = vsyncpa [#allocation4], 0 }
   0x5   :  { %15 = vsyncpa [#allocation4 + $0x1], 0  ;;  %s705_s9 = smov 0   ;;  %s707_s10 = smov 0  }
   0x6   :  { %s709_s11 = smov 0   ;;  %s711_s12 = smov 0  }
   0x7   :  { %s713_s13 = smov 0   ;;  %s715_s14 = smov 0  }
   0x8 LB: > { %s423_s15 = sadd.s32 4294967295, %s681_s14   ;;  %s424_s16 = sadd.s32 4294967294, %s681_s14   ;;  %s681_s14 = sphi %s715_s14, %s21_s14   ;;  %s677_s13 = sphi %s713_s13, %s977_s13   ;;  %s673_s12 = sphi %s711_s12, %s976_s12   ;;  %s669_s11 = sphi %s709_s11, %s975_s11   ;;  %s665_s10 = sphi %s707_s10, %s974_s10   ;;  %s661_s9 = sphi %s705_s9, %s973_s9  }
   0x9   : > { %s33_s17 = sadd.s32 1, %s677_s13  ;;  %s42_s18 = sadd.s32 1, %s669_s11 }
   0xa   : > { %p35_p0 = scmp.ge.s32.totalorder %s33_s17, 2  ;;  %p49_p1 = scmp.ne.s32.totalorder %s669_s11, %s665_s10 }
   0xb   : > { %p50_p2 = scmp.eq.s32.totalorder %s681_s14, 0  ;;  %p55_p3 = scmp.ne.s32.totalorder %s665_s10, %s661_s9 }
   0xc   : > { %s979_s17 = smov (%p35_p0, %s33_s17), 0  ;;  %p56_p5 = scmp.eq.s32.totalorder %s423_s15, 0 }
   0xd   : > { %p746_p4 = por %p50_p2, %p49_p1  ;;  %s39_s20 = ssub.s32 %s677_s13, %s979_s17 }
   0xe   : > { %p107_p6 = scmp.eq.s32.totalorder %s423_s15, 1  ;;  %p40_p7 = scmp.eq.s32.totalorder %s39_s20, 0 }
   0xf   : > { %p752_p8 = por %p56_p5, %p55_p3  ;;  %p113_p10 = scmp.eq.s32.totalorder %s424_s16, 1 }
  0x10   : > { %p756_p9 = por %p107_p6, %p49_p1  ;;  %p468_p13 = scmp.lt.s32.totalorder %s681_s14, 2 }
  0x11   : > { %s961_s21 = scalar_select %p752_p8, 1, 0 }
  0x12   : > { %s962_s22 = scalar_select %p756_p9, 1, 0 }
  0x13   : > { %s761_s23 = scalar_select %p40_p7, %s669_s11, %s42_s18  }
  0x14   : > { %p763_p11 = por %p113_p10, %p55_p3  ;;  %s770_s25 = sand.u32 1, %s669_s11  }
  0x15   : > { %s427_s26 = sshll.u32 %s770_s25, 4  ;;  %s448_s27 = sshll.u32 %s677_s13, 8 }
  0x16   : > { %s963_s24 = scalar_select %p763_p11, 1, 0 }
  0x17   : > { %s779_s30 = scalar_lea.hbm %s955_s0, %s448_s27  ;;  %s137_s3 = scalar_lea.vmem [#allocation2], %s427_s26 }
  0x18   : > { %s145_s4 = sshll.u32 %s137_s3, 4  ;;  %p787_p0 = pnand %p468_p13, %p746_p4  ;;  %s783_s4 = int_to_ptr.vmem [resolvable:$true] %s145_s4 }
  0x19   : > { %s134_s6 = scalar_lea.sflag [#allocation3], %s770_s25  ;;  %s535_s7 = scalar_lea.hbm %s779_s30, 256 }
  0x1a   : > { %p536_p2 = scmp.ne.s32.totalorder %s779_s30, %s535_s7  ;;  %p537_p3 = pneg %p787_p0 }
  0x1b   : > { %s540_s16 = scalar_lea.hbm %s955_s0, 512  ;;  %p541_p4 = scmp.lt.u32.totalorder %s779_s30, %s955_s0 }
  0x1c   : > { %p538_p5 = pnand %p537_p3, %p536_p2  ;;  %p542_p7 = scmp.lt.u32.totalorder %s540_s16, %s535_s7 }
  0x1d   : > { %p544_p13 = scmp.lt.u32.totalorder %s535_s7, %s779_s30 }
  0x1e   : > { %p539_p6 = pneg %p538_p5  ;;  %p543_p10 = por %p542_p7, %p541_p4 }
  0x20   : > { %p545_p12 = por %p544_p13, %p543_p10 }
  0x22   : > { %p546_p1 = pnand %p545_p12, %p539_p6 }
  0x24   : > { %549 = shalt.err (!%p546_p1)
}
  0x25   : > { %s550_s20 = scalar_lea.vmem %s783_s4, 256  ;;  %s683_s28 = smov [#allocation2]  }
  0x26   : > { %p551_p2 = scmp.ne.s32.totalorder %s783_s4, %s550_s20  ;;  %s555_s29 = sshll.u32 %s683_s28, 4  ;;  %s556_s29 = int_to_ptr.vmem [resolvable:$false] %s555_s29 }
  0x27   : > { %s557_s3 = scalar_lea.vmem %s556_s29, 512  ;;  %p558_p9 = scmp.lt.s32.totalorder %s783_s4, %s556_s29 }
  0x28   : > { %p553_p5 = pnand %p551_p2, %p537_p3  ;;  %p559_p4 = scmp.lt.s32.totalorder %s557_s3, %s550_s20 }
  0x2a   : > { %p554_p11 = pneg %p553_p5  ;;  %p560_p7 = por %p559_p4, %p558_p9 }
  0x2c   : > { %p561_p10 = pnand %p560_p7, %p554_p11 }
  0x2e   : > { %564 = shalt.err (!%p561_p10)
}
  0x2f   : > { %s684_s7 = smov 128   ;;  %s685_s8 = smov 8  }
  0x30   : > { %460 = dma.hbm_to_vmem [thread:$0]  (!%p787_p0), %s779_s30, 256, %s783_s4, %s134_s6, %s684_s7, %s684_s7, %s685_s8  }
  0x31   : > { %p175_p9 = scmp.lt.s32.totalorder %s681_s14, 3  ;;  %s829_s18 = scalar_lea.hbm %s956_s1, %s448_s27 }
  0x32   : > { %p965_p11 = scmp.ge.s32.totalorder %s681_s14, 1  ;;  %s159_s20 = scalar_lea.vmem [#allocation5], %s427_s26 }
  0x33   : > { %s167_s28 = sshll.u32 %s159_s20, 4  ;;  %s156_s30 = scalar_lea.sflag [#allocation6], %s770_s25  ;;  %s839_s28 = int_to_ptr.vmem [resolvable:$true] %s167_s28 }
  0x34   : > { %p833_p12 = pnand %p965_p11, %p175_p9  ;;  %s565_s4 = scalar_lea.hbm %s829_s18, 256 }
  0x35   : > { %p566_p1 = scmp.ne.s32.totalorder %s829_s18, %s565_s4  ;;  %s570_s29 = scalar_lea.hbm %s956_s1, 512 }
  0x36   : > { %p571_p2 = scmp.lt.u32.totalorder %s829_s18, %s956_s1  ;;  %p572_p5 = scmp.lt.u32.totalorder %s570_s29, %s565_s4 }
  0x37   : > { %p568_p6 = pnand %p566_p1, %p537_p3  ;;  %p574_p7 = scmp.lt.u32.totalorder %s565_s4, %s829_s18 }
  0x38   : > { %p573_p4 = por %p572_p5, %p571_p2 }
  0x39   : > { %p569_p13 = pneg %p568_p6 }
  0x3a   : > { %p575_p10 = por %p574_p7, %p573_p4 }
  0x3c   : > { %p576_p9 = pnand %p575_p10, %p569_p13 }
  0x3e   : > { %579 = shalt.err (!%p576_p9)
}
  0x3f   : > { %s580_s26 = scalar_lea.vmem %s839_s28, 256  ;;  %s686_s16 = smov [#allocation5]  }
  0x40   : > { %p581_p11 = scmp.ne.s32.totalorder %s839_s28, %s580_s26  ;;  %s585_s20 = sshll.u32 %s686_s16, 4  ;;  %s586_s20 = int_to_ptr.vmem [resolvable:$false] %s585_s20 }
  0x41   : > { %s587_s27 = scalar_lea.vmem %s586_s20, 512  ;;  %p588_p8 = scmp.lt.s32.totalorder %s839_s28, %s586_s20 }
  0x42   : > { %p583_p1 = pnand %p581_p11, %p537_p3  ;;  %p589_p2 = scmp.lt.s32.totalorder %s587_s27, %s580_s26 }
  0x44   : > { %p584_p6 = pneg %p583_p1  ;;  %p590_p5 = por %p589_p2, %p588_p8 }
  0x46   : > { %p591_p4 = pnand %p590_p5, %p584_p6 }
  0x48   : > { %594 = shalt.err (!%p591_p4)
}
  0x49   : > { %463 = dma.hbm_to_vmem [thread:$0]  (!%p787_p0), %s829_s18, 256, %s839_s28, %s156_s30, %s684_s7, %s684_s7, %s685_s8  }
  0x4a   : > { %179 = sbr.rel (%p833_p12) target bundleno = 142 (0x8e), region = 28  ;;  %s873_s4 = sand.u32 (!%p833_p12), 1, %s665_s10  }
  0x4b   : > { %s434_s6 = sshll.u32 (!%p833_p12), %s873_s4, 4  ;;  %s182_s29 = scalar_lea.sflag (!%p833_p12), [#allocation3], %s873_s4 }
  0x4c   : > { %s185_s5 = scalar_lea.vmem (!%p833_p12), [#allocation2], %s434_s6  ;;  %p967_p8 = scmp.ne.s32.totalorder (!%p833_p12), %s961_s21, 0 }
  0x51   : > { %648 = dma.done.wait (%p967_p8), %s182_s29, 256  }
  0x52   : > { %650 = vsyncadd (%p967_p8), %s182_s29, 4294967040  ;;  %s191_s25 = scalar_lea.sflag [#allocation6], %s873_s4  ;;  %s194_s7 = scalar_lea.vmem [#allocation5], %s434_s6 }
  0x53   : > { %652 = dma.done.wait (%p967_p8), %s191_s25, 256  }
  0x54   : > { %654 = vsyncadd (%p967_p8), %s191_s25, 4294967040  ;;  %v232_v0 = vld [vmem:[%s185_s5] sm:$0xff]  ;;  %v233_v1 = vld [vmem:[%s185_s5 + $0x8] sm:$0xff]  ;;  %s436_s8 = sshll.u32 %s873_s4, 5  ;;  %s450_s21 = sshll.u32 %s673_s12, 9 }
  0x55   : > { %v236_v2 = vand.u32 2147483647, %v232_v0  ;;  %v237_v3 = vand.u32 2147483647, %v233_v1  ;;  %v234_v4 = vld [vmem:[%s194_s7] sm:$0xff]  ;;  %v235_v5 = vld [vmem:[%s194_s7 + $0x8] sm:$0xff]  ;;  %s903_s3 = scalar_lea.hbm %s957_s2, %s450_s21 }
  0x56   : > { %v288_v8 = vadd.f32 %v235_v5, %v234_v4  ;;  %s887_s18 = scalar_lea.vmem [#allocation7], %s436_s8  ;;  %vm250_vm0 = vcmp.ge.f32.partialorder %v232_v0, 0.0  ;;  %vm251_vm1 = vcmp.ge.f32.partialorder %v233_v1, 0.0  ;;  %v274_v29 = vmax.f32 %v232_v0, 0.0  ;;  %s304_s15 = scalar_lea.sflag [#allocation4], %s873_s4 }
  0x57   : > { %v238_v6 = vsub.f32 0.0, %v236_v2  ;;  %v239_v7 = vsub.f32 0.0, %v237_v3  ;;  %v275_v33 = vmax.f32 %v233_v1, 0.0  ;;  %v278_v37 = vmul.f32 %v234_v4, %v232_v0  ;;  %s317_s19 = sshll.u32 %s887_s18, 4  ;;  %p970_p3 = scmp.ne.s32.totalorder %s962_s22, 0  ;;  %s905_s19 = int_to_ptr.vmem [resolvable:$true] %s317_s19 }
  0x58   : > { %438 = vst [vmem:[%s887_s18 + $0x8] sm:$0xff] %v288_v8  ;;  %v279_v41 = vmul.f32 %v235_v5, %v233_v1  ;;  %s595_s26 = scalar_lea.vmem %s905_s19, 512  ;;  %s687_s12 = smov [#allocation7]  }
  0x59   : > { %v240_v9 = vmul.f32 1.442695, %v238_v6  ;;  %v242_v10 = vmul.f32 1.442695, %v239_v7  ;;  %p596_p0 = scmp.ne.s32.totalorder %s905_s19, %s595_s26  ;;  %s599_s16 = sshll.u32 %s687_s12, 4  ;;  %s600_s16 = int_to_ptr.vmem [resolvable:$false] %s599_s16 }
  0x5a   : > { %s601_s20 = scalar_lea.vmem %s600_s16, 1024  ;;  %p602_p7 = scmp.lt.s32.totalorder %s905_s19, %s600_s16 }
  0x5b   : > { %523 = vpow2.f32 %v240_v9  ;;  %p597_p12 = pnand %p596_p0, %p970_p3  ;;  %p603_p10 = scmp.lt.s32.totalorder %s601_s20, %s595_s26 }
  0x5c   : > { %525 = vpow2.f32 %v242_v10 }
  0x5d   : > { %p598_p13 = pneg %p597_p12  ;;  %p604_p9 = por %p603_p10, %p602_p7 }
  0x5f   : > { %p605_p11 = pnand %p604_p9, %p598_p13 }
  0x65   : > { %v524_v11 = vpop.eup %523 }
  0x66   : > { %v526_v12 = vpop.eup %525  ;;  %v244_v13 = vadd.f32 1.0, %v524_v11  ;;  %v259_v15 = vmul.f32 -0.5, %v524_v11  ;;  %v262_v18 = vand.u32 2147483647, %v524_v11 }
  0x67   : > { %v245_v14 = vadd.f32 1.0, %v526_v12  ;;  %v268_v16 = vmul.f32 -0.5, %v526_v12  ;;  %v271_v20 = vand.u32 2147483647, %v526_v12 }
  0x68   : > { %527 = vrcp.f32 %v244_v13  ;;  %v260_v17 = vadd.f32 1.0, %v259_v15  ;;  %vm890_vm2 = vcmp.lt.f32.partialorder %v262_v18, 0.0004427343 }
  0x69   : > { %529 = vrcp.f32 %v245_v14  ;;  %v269_v19 = vadd.f32 1.0, %v268_v16  ;;  %vm272_vm3 = vcmp.lt.f32.partialorder %v271_v20, 0.0004427343 }
  0x6a   : > { %531 = vlog2.f32 %v244_v13  ;;  %v261_v24 = vmul.f32 %v524_v11, %v260_v17 }
  0x6b   : > { %533 = vlog2.f32 %v245_v14  ;;  %v270_v28 = vmul.f32 %v526_v12, %v269_v19 }
  0x72   : > { %v528_v21 = vpop.eup %527 }
  0x73   : > { %v530_v22 = vpop.eup %529  ;;  %v252_v23 = vmul.f32 %v528_v21, %v524_v11 }
  0x74   : > { %v532_v25 = vpop.eup %531  ;;  %v253_v26 = vmul.f32 %v530_v22, %v526_v12 }
  0x75   : > { %v534_v30 = vpop.eup %533  ;;  %v254_v31 = vsel %vm250_vm0, %v528_v21, %v252_v23  ;;  %v258_v32 = vmul.f32 0.6931472, %v532_v25 }
  0x76   : > { %v255_v34 = vsel %vm251_vm1, %v530_v22, %v253_v26  ;;  %v293_v35 = vmul.f32 %v254_v31, %v234_v4  ;;  %v267_v36 = vmul.f32 0.6931472, %v534_v30 }
  0x77   : > { %v283_v38 = vadd.f32 %v255_v34, %v254_v31  ;;  %v294_v39 = vmul.f32 %v255_v34, %v235_v5  ;;  %v264_v40 = vsel %vm890_vm2, %v261_v24, %v258_v32 }
  0x78   : > { %v273_v42 = vsel %vm272_vm3, %v270_v28, %v267_v36  ;;  %v276_v43 = vadd.f32 %v274_v29, %v264_v40 }
  0x79   : > { %v295_v44 = vadd.f32 %v294_v39, %v293_v35  ;;  %v277_v45 = vadd.f32 %v275_v33, %v273_v42  ;;  %285 = vst [vmem:[%s887_s18] sm:$0xff] %v283_v38 }
  0x7a   : > { %v280_v46 = vsub.f32 %v276_v43, %v278_v37 }
  0x7b   : > { %v281_v47 = vsub.f32 %v277_v45, %v279_v41  ;;  %440 = vst [vmem:[%s887_s18 + $0x10] sm:$0xff] %v295_v44 }
  0x7d   : > { %v300_v48 = vadd.f32 %v281_v47, %v280_v46 }
  0x7f   : > { %442 = vst [vmem:[%s887_s18 + $0x18] sm:$0xff] %v300_v48 }
  0x80   : > { %608 = shalt.err (!%p605_p11)
}
  0x81   : > { %s609_s27 = scalar_lea.hbm %s903_s3, 512  ;;  %s613_s5 = scalar_lea.hbm %s957_s2, 1024 }
  0x82   : > { %p610_p1 = scmp.ne.s32.totalorder %s903_s3, %s609_s27  ;;  %p614_p5 = scmp.lt.u32.totalorder %s903_s3, %s957_s2 }
  0x83   : > { %p615_p4 = scmp.lt.u32.totalorder %s613_s5, %s609_s27  ;;  %p617_p0 = scmp.lt.u32.totalorder %s609_s27, %s903_s3 }
  0x84   : > { %p611_p6 = pnand %p610_p1, %p970_p3 }
  0x85   : > { %p616_p8 = por %p615_p4, %p614_p5 }
  0x86   : > { %p612_p2 = pneg %p611_p6 }
  0x87   : > { %p618_p12 = por %p617_p0, %p616_p8 }
  0x89   : > { %p619_p13 = pnand %p618_p12, %p612_p2 }
  0x8b   : > { %622 = shalt.err (!%p619_p13)
}
  0x8c   : > { %s688_s8 = smov 128   ;;  %s689_s18 = smov 8  }
  0x8d   : > { %455 = dma.vmem_to_hbm [thread:$0]  (%p970_p3), %s905_s19, 512, %s903_s3, %s304_s15, %s688_s8, %s688_s8, %s689_s18  }
  0x8e PF: > { %s332_s21 = sand.u32 1, %s661_s9   ;;  %p971_p7 = scmp.ne.s32.totalorder %s963_s24, 0 }
  0x8f   : > { %p972_p10 = scmp.ge.s32.totalorder %s681_s14, 2  ;;  %s333_s28 = scalar_lea.sflag [#allocation4], %s332_s21 }
  0x91   : > { %p465_p9 = pnand %p972_p10, %p971_p7 }
  0x93   : > { %656 = dma.done.wait (!%p465_p9), %s333_s28, 512  }
  0x94   : > { %658 = vsyncadd (!%p465_p9), %s333_s28, 4294966784  ;;  %s21_s14 = sadd.s32 1, %s681_s14   ;;  %s973_s9 = smov %s665_s10 }
  0x95   : > { %p18_p11 = scmp.ge.s32.totalorder %s21_s14, 4   ;;  %s974_s10 = smov %s669_s11 }
  0x96   : > { %s975_s11 = smov %s761_s23  ;;  %s976_s12 = smov %s677_s13 }
  0x97   : > { %s977_s13 = smov %s979_s17  ;;  %20 = sbr.rel (!%p18_p11) target bundleno = 8 (0x8), region = 93 }
  0x9e   :  { %338 = vsyncpa [#allocation3], 1 }
  0x9f   :  { %340 = vsyncpa [#allocation3 + $0x1], 1 }
  0xa0   :  { %341 = vsyncpa [#allocation6], 1 }
  0xa1   :  { %343 = vsyncpa [#allocation6 + $0x1], 1 }
  0xa2   :  { %344 = vsyncpa [#allocation4], 1 }
  0xa3   :  { %346 = vsyncpa [#allocation4 + $0x1], 1 }

</bundles_post_ra>
